<compile_context>
chip_gen: v7x
topology: tpu7x:2x2x1
jax: 0.10.0
libtpu: 0.0.40
codegen_flags: <defaults>
</compile_context>

<pallas_src>
import jax
import jax.numpy as jnp
from jax.experimental import pallas as pl
from jax.experimental.pallas import tpu as pltpu


def _round_up(n, m):
    return ((n + m - 1) // m) * m


def rnn_seq_kernel(x_ref, h0_ref, w_ref, b_ref, hseq_ref, z_ref, h_ref):
    """One grid step == one RNN time step.

    x_ref:    (1, Bp, Ip)   current input slice (time-blocked)
    h0_ref:   (Bp, Hp)      initial hidden state (constant block, resident)
    w_ref:    (Kp, Hp)      fused [w_ih; w_hh], resident in VMEM
    b_ref:    (1, Hp)       fused bias, resident in VMEM
    hseq_ref: (1, Bp, Hp)   per-step hidden-state output (time-blocked)
    z_ref:    (Bp, Kp)      VMEM scratch: concat(x_t, h)
    h_ref:    (Bp, Hp)      VMEM scratch: carried hidden state (f32)
    """
    t = pl.program_id(0)
    ipad = x_ref.shape[2]  # static, 128-aligned -> aligned block writes below

    @pl.when(t == 0)
    def _():
        h_ref[...] = h0_ref[...]

    # Build z = [x_t | h]  (both halves start on 128-lane boundaries).
    z_ref[:, :ipad] = x_ref[0]
    z_ref[:, ipad:] = h_ref[...]

    # Single fused MXU matmul + f32 epilogue (bias + tanh on EUP).
    pre = jnp.dot(z_ref[...], w_ref[...], preferred_element_type=jnp.float32)
    h_new = jnp.tanh(pre + b_ref[...])

    h_ref[...] = h_new
    hseq_ref[0] = h_new.astype(hseq_ref.dtype)


def rnn_forward(x_seq, h0, w_ih, w_hh, b_ih, b_hh):
    """Runs the RNN cell over a sequence.

    x_seq: [T, B, I], h0: [B, H], w_ih: [I, H], w_hh: [H, H], b_*: [H]
    Returns the hidden state after every step: [T, B, H].
    """
    T, B, I = x_seq.shape
    H = w_hh.shape[1]
    out_dtype = x_seq.dtype

    Bp = _round_up(max(B, 1), 8)     # sublane-dense batch
    Ip = _round_up(max(I, 1), 128)   # lane-dense input width
    Hp = _round_up(max(H, 1), 128)   # lane-dense hidden width
    Kp = Ip + Hp

    # Fuse + zero-pad the parameters once.  Padded hidden columns have zero
    # weight rows and zero bias -> tanh(0) = 0, so the padded part of h stays
    # exactly zero across every step and never leaks into valid columns.
    W = jnp.zeros((Kp, Hp), jnp.float32)
    W = W.at[:I, :H].set(w_ih.astype(jnp.float32))
    W = W.at[Ip:Ip + H, :H].set(w_hh.astype(jnp.float32))
    b = jnp.zeros((1, Hp), jnp.float32)
    b = b.at[0, :H].set((b_ih + b_hh).astype(jnp.float32))

    xp = jnp.zeros((T, Bp, Ip), jnp.float32)
    xp = xp.at[:, :B, :I].set(x_seq.astype(jnp.float32))
    hp = jnp.zeros((Bp, Hp), jnp.float32)
    hp = hp.at[:B, :H].set(h0.astype(jnp.float32))

    cost = pl.CostEstimate(
        flops=2 * T * Bp * Kp * Hp,
        transcendentals=T * Bp * Hp,
        bytes_accessed=4 * (xp.size + W.size + b.size + hp.size + T * Bp * Hp),
    )

    h_seq = pl.pallas_call(
        rnn_seq_kernel,
        out_shape=jax.ShapeDtypeStruct((T, Bp, Hp), jnp.float32),
        grid_spec=pltpu.PrefetchScalarGridSpec(
            num_scalar_prefetch=0,
            grid=(T,),
            in_specs=[
                pl.BlockSpec((1, Bp, Ip), lambda t: (t, 0, 0)),   # x_t (streamed)
                pl.BlockSpec((Bp, Hp), lambda t: (0, 0)),         # h0 (resident)
                pl.BlockSpec((Kp, Hp), lambda t: (0, 0)),         # W  (resident)
                pl.BlockSpec((1, Hp), lambda t: (0, 0)),          # b  (resident)
            ],
            out_specs=pl.BlockSpec((1, Bp, Hp), lambda t: (t, 0, 0)),
            scratch_shapes=[
                pltpu.VMEM((Bp, Kp), jnp.float32),  # z = [x_t | h]
                pltpu.VMEM((Bp, Hp), jnp.float32),  # carried hidden state
            ],
        ),
        compiler_params=pltpu.CompilerParams(
            # The time axis must stay sequential: the VMEM-carried hidden
            # state is the recurrent dependency.
            dimension_semantics=("arbitrary",),
        ),
        cost_estimate=cost,
    )(xp, hp, W, b)

    # TODO(synk): for very large H on v7x (64 MiB VMEM), tile W's output
    # columns with an inner "arbitrary" axis instead of keeping W fully
    # resident; also precompute x @ w_ih for all T in one big matmul.
    return h_seq[:, :B, :H].astype(out_dtype)


def rnn_cell(x, h, w_ih, w_hh, b_ih, b_hh):
    """Single RNN-cell step (the PyTorch module's forward): T=1 of rnn_forward."""
    return rnn_forward(x[None], h, w_ih, w_hh, b_ih, b_hh)[0]


def init_params(key, input_size, hidden_size, dtype=jnp.float32):
    # Mirrors torch.nn.Linear init; weights stored pre-transposed to [in, out].
    k1, k2, k3, k4 = jax.random.split(key, 4)
    bound_ih = 1.0 / (input_size ** 0.5)
    bound_hh = 1.0 / (hidden_size ** 0.5)
    w_ih = jax.random.uniform(k1, (input_size, hidden_size), dtype,
                              minval=-bound_ih, maxval=bound_ih)
    b_ih = jax.random.uniform(k2, (hidden_size,), dtype,
                              minval=-bound_ih, maxval=bound_ih)
    w_hh = jax.random.uniform(k3, (hidden_size, hidden_size), dtype,
                              minval=-bound_hh, maxval=bound_hh)
    b_hh = jax.random.uniform(k4, (hidden_size,), dtype,
                              minval=-bound_hh, maxval=bound_hh)
    return w_ih, b_ih, w_hh, b_hh


if __name__ == "__main__":
    key = jax.random.PRNGKey(0)
    batch, input_size, hidden_size, seq = 2, 4, 32, 8

    kx, kh, kp = jax.random.split(key, 3)
    x_seq = jax.random.normal(kx, (seq, batch, input_size), jnp.float32)
    h0 = jax.random.normal(kh, (batch, hidden_size), jnp.float32)
    w_ih, b_ih, w_hh, b_hh = init_params(kp, input_size, hidden_size)

    # --- single-step semantics (the PyTorch module's forward) ---
    out_step = rnn_cell(x_seq[0], h0, w_ih, w_hh, b_ih, b_hh)
    out_step = jax.block_until_ready(out_step)
    ref_step = jnp.tanh(x_seq[0] @ w_ih + b_ih[None, :] + h0 @ w_hh + b_hh[None, :])
    assert out_step.shape == (batch, hidden_size)
    assert jnp.allclose(out_step, ref_step, atol=1e-4, rtol=1e-4)

    # --- full-sequence kernel (weights resident, time loop inside the kernel) ---
    out_seq = rnn_forward(x_seq, h0, w_ih, w_hh, b_ih, b_hh)
    out_seq = jax.block_until_ready(out_seq)

    def ref_scan(x_seq, h0):
        def step(h, xt):
            h_new = jnp.tanh(xt @ w_ih + b_ih[None, :] + h @ w_hh + b_hh[None, :])
            return h_new, h_new
        _, hs = jax.lax.scan(step, h0, x_seq)
        return hs

    ref_seq = ref_scan(x_seq, h0)
    assert out_seq.shape == (seq, batch, hidden_size)
    assert jnp.allclose(out_seq, ref_seq, atol=1e-4, rtol=1e-4)

    print("KERNEL_OK")
</pallas_src>

<mosaic_0001>
module attributes {stable_mosaic.version = 11 : i64} {
  func.func @rnn_seq_kernel(%arg0: i32, %arg1: memref<1x8x128xf32, #tpu.memory_space<vmem>>, %arg2: memref<8x128xf32, #tpu.memory_space<vmem>>, %arg3: memref<256x128xf32, #tpu.memory_space<vmem>>, %arg4: memref<1x128xf32, #tpu.memory_space<vmem>>, %arg5: memref<1x8x128xf32, #tpu.memory_space<vmem>>, %arg6: memref<8x256xf32, #tpu.memory_space<vmem>>, %arg7: memref<8x128xf32, #tpu.memory_space<vmem>>) attributes {dimension_semantics = [#tpu.dimension_semantics<arbitrary>], iteration_bounds = array<i64: 1>, scalar_prefetch = 0 : i64, scratch_operands = 2 : i64, tpu.core_type = #tpu.core_type<tc>, window_params = [{transform_indices = @transform_0, window_bounds = array<i64: 1, 8, 128>}, {pipeline_mode = #tpu.pipeline_mode<synchronous>, transform_indices = @transform_1, window_bounds = array<i64: 8, 128>}, {pipeline_mode = #tpu.pipeline_mode<synchronous>, transform_indices = @transform_2, window_bounds = array<i64: 256, 128>}, {pipeline_mode = #tpu.pipeline_mode<synchronous>, transform_indices = @transform_3, window_bounds = array<i64: 1, 128>}, {transform_indices = @transform_4, window_bounds = array<i64: 1, 8, 128>}]} {
    %c0_i32 = arith.constant 0 : i32
    %0 = arith.cmpi eq, %arg0, %c0_i32 : i32
    %1 = arith.extui %0 : i1 to i32
    %c0_i32_0 = arith.constant 0 : i32
    %2 = arith.cmpi ne, %1, %c0_i32_0 : i32
    scf.if %2 {
      %c0_19 = arith.constant 0 : index
      %c0_20 = arith.constant 0 : index
      %19 = vector.load %arg2[%c0_19, %c0_20] : memref<8x128xf32, #tpu.memory_space<vmem>>, vector<8x128xf32>
      %c0_21 = arith.constant 0 : index
      %c0_22 = arith.constant 0 : index
      %20 = vector.load %arg7[%c0_21, %c0_22] : memref<8x128xf32, #tpu.memory_space<vmem>>, vector<8x128xf32>
      tpu.vector_store %arg7[%c0_21, %c0_22], %19 {strides = array<i32>} : memref<8x128xf32, #tpu.memory_space<vmem>>, vector<8x128xf32>,
    } else {
    }
    %c0 = arith.constant 0 : index
    %c0_1 = arith.constant 0 : index
    %c0_2 = arith.constant 0 : index
    %3 = vector.load %arg1[%c0, %c0_1, %c0_2] : memref<1x8x128xf32, #tpu.memory_space<vmem>>, vector<1x8x128xf32>
    %4 = vector.shape_cast %3 : vector<1x8x128xf32> to vector<8x128xf32>
    %c0_3 = arith.constant 0 : index
    %c0_4 = arith.constant 0 : index
    %5 = vector.load %arg6[%c0_3, %c0_4] : memref<8x256xf32, #tpu.memory_space<vmem>>, vector<8x128xf32>
    tpu.vector_store %arg6[%c0_3, %c0_4], %4 {strides = array<i32>} : memref<8x256xf32, #tpu.memory_space<vmem>>, vector<8x128xf32>,
    %c0_5 = arith.constant 0 : index
    %c0_6 = arith.constant 0 : index
    %6 = vector.load %arg7[%c0_5, %c0_6] : memref<8x128xf32, #tpu.memory_space<vmem>>, vector<8x128xf32>
    %c0_7 = arith.constant 0 : index
    %c128 = arith.constant 128 : index
    %7 = vector.load %arg6[%c0_7, %c128] : memref<8x256xf32, #tpu.memory_space<vmem>>, vector<8x128xf32>
    tpu.vector_store %arg6[%c0_7, %c128], %6 {strides = array<i32>} : memref<8x256xf32, #tpu.memory_space<vmem>>, vector<8x128xf32>,
    %c0_8 = arith.constant 0 : index
    %c0_9 = arith.constant 0 : index
    %8 = vector.load %arg6[%c0_8, %c0_9] : memref<8x256xf32, #tpu.memory_space<vmem>>, vector<8x256xf32>
    %c0_10 = arith.constant 0 : index
    %c0_11 = arith.constant 0 : index
    %9 = vector.load %arg3[%c0_10, %c0_11] : memref<256x128xf32, #tpu.memory_space<vmem>>, vector<256x128xf32>
    %cst = arith.constant dense<0.000000e+00> : vector<8x128xf32>
    %10 = tpu.matmul %8, %9, %cst {dimension_numbers = #tpu.dot_dimension_numbers<[1], [0], [0], [1], [0, 0, 1, 1], [], []>} : vector<8x256xf32>, vector<256x128xf32>, vector<8x128xf32> -> vector<8x128xf32>
    %c0_12 = arith.constant 0 : index
    %c0_13 = arith.constant 0 : index
    %11 = vector.load %arg4[%c0_12, %c0_13] : memref<1x128xf32, #tpu.memory_space<vmem>>, vector<1x128xf32>
    %12 = vector.broadcast %11 : vector<1x128xf32> to vector<8x128xf32>
    %13 = arith.addf %10, %12 : vector<8x128xf32>
    %14 = math.tanh %13 : vector<8x128xf32>
    %c0_14 = arith.constant 0 : index
    %c0_15 = arith.constant 0 : index
    %15 = vector.load %arg7[%c0_14, %c0_15] : memref<8x128xf32, #tpu.memory_space<vmem>>, vector<8x128xf32>
    tpu.vector_store %arg7[%c0_14, %c0_15], %14 {strides = array<i32>} : memref<8x128xf32, #tpu.memory_space<vmem>>, vector<8x128xf32>,
    %c0_16 = arith.constant 0 : index
    %c0_17 = arith.constant 0 : index
    %c0_18 = arith.constant 0 : index
    %16 = vector.load %arg5[%c0_16, %c0_17, %c0_18] : memref<1x8x128xf32, #tpu.memory_space<vmem>>, vector<1x8x128xf32>
    %17 = vector.shape_cast %16 : vector<1x8x128xf32> to vector<8x128xf32>
    %18 = vector.shape_cast %14 : vector<8x128xf32> to vector<1x8x128xf32>
    tpu.vector_store %arg5[%c0_16, %c0_17, %c0_18], %18 {strides = array<i32>} : memref<1x8x128xf32, #tpu.memory_space<vmem>>, vector<1x8x128xf32>,
    return
  }
  func.func @transform_0(%arg0: i32) -> (i32, i32, i32) {
    %c0_i32 = arith.constant 0 : i32
    %c0_i32_0 = arith.constant 0 : i32
    %c0_i32_1 = arith.constant 0 : i32
    return %arg0, %c0_i32, %c0_i32_0 : i32, i32, i32
  }
  func.func @transform_1(%arg0: i32) -> (i32, i32) {
    %c0_i32 = arith.constant 0 : i32
    %c0_i32_0 = arith.constant 0 : i32
    %c0_i32_1 = arith.constant 0 : i32
    return %c0_i32, %c0_i32_0 : i32, i32
  }
  func.func @transform_2(%arg0: i32) -> (i32, i32) {
    %c0_i32 = arith.constant 0 : i32
    %c0_i32_0 = arith.constant 0 : i32
    %c0_i32_1 = arith.constant 0 : i32
    return %c0_i32, %c0_i32_0 : i32, i32
  }
  func.func @transform_3(%arg0: i32) -> (i32, i32) {
    %c0_i32 = arith.constant 0 : i32
    %c0_i32_0 = arith.constant 0 : i32
    %c0_i32_1 = arith.constant 0 : i32
    return %c0_i32, %c0_i32_0 : i32, i32
  }
  func.func @transform_4(%arg0: i32) -> (i32, i32, i32) {
    %c0_i32 = arith.constant 0 : i32
    %c0_i32_0 = arith.constant 0 : i32
    %c0_i32_1 = arith.constant 0 : i32
    return %arg0, %c0_i32, %c0_i32_0 : i32, i32, i32
  }
}

</mosaic_0001>

<bundles_post_ra>
// kernel: tpu_custom_call.1
= control target key start
LH: loop header
LB: loop body
LE: loop exit
PB: predicated region body
PF: predicated region fallthrough
CT: control target
= control target key end

     0   :  { %9 = vsyncpa [#allocation5], 0  ;;  %s447_s0 = inlined_call_operand.hbm [shape: f32[1,8,128], index: 0, kind: input, shape index: {}]   ;;  %s448_s1 = inlined_call_operand.hbm [shape: f32[8,128], index: 1, kind: input, shape index: {}]   ;;  %s449_s2 = inlined_call_operand.hbm [shape: f32[256,128], index: 2, kind: input, shape index: {}]   ;;  %s450_s3 = inlined_call_operand.vmem [shape: f32[1,128], index: 3, kind: input, shape index: {}]   ;;  %s451_s4 = inlined_call_operand.hbm [shape: f32[1,8,128], index: 4, kind: output, shape index: {}]  }
   0x1   :  { %10 = vsyncpa [#allocation8], 0 }
   0x2   :  { %11 = vsyncpa [#allocation6], 0  ;;  %s365_s15 = smov [#allocation7]   ;;  %s366_s17 = smov [#allocation4]  }
   0x3   :  { %s28_s16 = sshll.u32 %s365_s15, 4  ;;  %s18_s18 = sshll.u32 %s366_s17, 4  ;;  %s29_s16 = int_to_ptr.vmem [resolvable:$true] %s28_s16  ;;  %s19_s18 = int_to_ptr.vmem [resolvable:$true] %s18_s18 }
   0x4   :  { %s271_s21 = scalar_lea.hbm %s448_s1, 128 }
   0x5   :  { %p272_p0 = scmp.ne.s32.totalorder %s448_s1, %s271_s21  ;;  %p275_p1 = scmp.lt.u32.totalorder %s271_s21, %s448_s1 }
   0x7   :  { %p277_p2 = pnand %p275_p1, %p272_p0 }
   0x9   :  { %280 = shalt.err (!%p277_p2)
}
   0xa   :  { %s281_s26 = scalar_lea.vmem %s29_s16, 128  ;;  %p286_p4 = scmp.lt.s32.totalorder %s29_s16, %s29_s16 }
   0xb   :  { %p282_p3 = scmp.ne.s32.totalorder %s29_s16, %s281_s26  ;;  %p287_p5 = scmp.lt.s32.totalorder %s281_s26, %s281_s26 }
   0xd   :  { %p288_p6 = por %p287_p5, %p286_p4 }
   0xf   :  { %p289_p7 = pnand %p288_p6, %p282_p3 }
  0x11   :  { %292 = shalt.err (!%p289_p7)
}
  0x12   :  { %31 = dma.hbm_to_vmem [thread:$0]  %s448_s1, 128, %s29_s16, [#allocation8]  }
  0x13   :  { %s293_s5 = scalar_lea.hbm %s447_s0, 128 }
  0x14   :  { %p294_p8 = scmp.ne.s32.totalorder %s447_s0, %s293_s5  ;;  %p297_p9 = scmp.lt.u32.totalorder %s293_s5, %s447_s0 }
  0x16   :  { %p299_p10 = pnand %p297_p9, %p294_p8 }
  0x18   :  { %302 = shalt.err (!%p299_p10)
}
  0x19   :  { %s303_s10 = scalar_lea.vmem %s19_s18, 128  ;;  %p308_p12 = scmp.lt.s32.totalorder %s19_s18, %s19_s18 }
  0x1a   :  { %p304_p11 = scmp.ne.s32.totalorder %s19_s18, %s303_s10  ;;  %p309_p13 = scmp.lt.s32.totalorder %s303_s10, %s303_s10 }
  0x1c   :  { %p310_p0 = por %p309_p13, %p308_p12 }
  0x1e   :  { %p311_p1 = pnand %p310_p0, %p304_p11 }
  0x20   :  { %314 = shalt.err (!%p311_p1)
}
  0x21   :  { %21 = dma.hbm_to_vmem [thread:$0]  %s447_s0, 128, %s19_s18, [#allocation5]  }
  0x22   :  { %s367_s12 = smov [#allocation9]   ;;  %s315_s16 = scalar_lea.hbm %s449_s2, 4096 }
  0x23   :  { %s37_s13 = sshll.u32 %s367_s12, 4  ;;  %p316_p2 = scmp.ne.s32.totalorder %s449_s2, %s315_s16  ;;  %s38_s13 = int_to_ptr.vmem [resolvable:$true] %s37_s13 }
  0x24   :  { %p319_p3 = scmp.lt.u32.totalorder %s315_s16, %s449_s2 }
  0x26   :  { %p321_p4 = pnand %p319_p3, %p316_p2 }
  0x28   :  { %324 = shalt.err (!%p321_p4)
}
  0x29   :  { %s325_s22 = scalar_lea.vmem %s38_s13, 4096  ;;  %p330_p6 = scmp.lt.s32.totalorder %s38_s13, %s38_s13 }
  0x2a   :  { %p326_p5 = scmp.ne.s32.totalorder %s38_s13, %s325_s22  ;;  %p331_p7 = scmp.lt.s32.totalorder %s325_s22, %s325_s22 }
  0x2c   :  { %p332_p8 = por %p331_p7, %p330_p6 }
  0x2e   :  { %p333_p9 = pnand %p332_p8, %p326_p5 }
  0x30   :  { %336 = shalt.err (!%p333_p9)
}
  0x31   :  { %s368_s0 = smov 128   ;;  %s369_s18 = smov 8  }
  0x32   :  { %43 = dma.hbm_to_vmem [thread:$0]  %s449_s2, 4096, %s38_s13, [#allocation8], %s368_s0, %s368_s0, %s369_s18  }
  0x33   :  { %359 = dma.done.wait [#allocation5], 128  }
  0x34   :  { %360 = vsyncadd [#allocation5], 4294967168 }
  0x35   :  { %361 = dma.done.wait [#allocation8], 4224  }
  0x36   :  { %362 = vsyncadd [#allocation8], 4294963072  ;;  %v83_v0 = vld [vmem:[#allocation9 + $0x80] sm:$0xff]  ;;  %v84_v1 = vld [vmem:[#allocation9 + $0x88] sm:$0xff]  ;;  %s370_s26 = smov [#allocation10]  }
  0x37   :  { %v67_v2 = vld [vmem:[#allocation9] sm:$0xff]  ;;  %v231_v3 = vpack.c.bf16 %v84_v1, %v83_v0  ;;  %v68_v4 = vld [vmem:[#allocation9 + $0x8] sm:$0xff]  ;;  %v85_v5 = vld [vmem:[#allocation9 + $0x90] sm:$0xff]  ;;  %s185_s27 = sshll.u32 %s370_s26, 4  ;;  %s186_s27 = int_to_ptr.vmem [resolvable:$true] %s185_s27 }
  0x38   :  { %v86_v6 = vld [vmem:[#allocation9 + $0x98] sm:$0xff]  ;;  %v233_v7 = vpack.c.bf16 %v68_v4, %v67_v2  ;;  %v69_v9 = vld [vmem:[#allocation9 + $0x10] sm:$0xff]  ;;  %v87_v11 = vld [vmem:[#allocation9 + $0xa0] sm:$0xff]  ;;  %s337_s28 = scalar_lea.vmem %s186_s27, 128  ;;  %p342_p11 = scmp.lt.s32.totalorder %s186_s27, %s186_s27 }
  0x39   :  { %v235_v8 = vpack.c.bf16 %v86_v6, %v85_v5  ;;  %v70_v10 = vld [vmem:[#allocation9 + $0x18] sm:$0xff]  ;;  %232 = vmatprep.subr.bf16.mxu0 %v231_v3  ;;  %v88_v12 = vld [vmem:[#allocation9 + $0xa8] sm:$0xff]  ;;  %v71_v15 = vld [vmem:[#allocation9 + $0x20] sm:$0xff]  ;;  %p338_p10 = scmp.ne.s32.totalorder %s186_s27, %s337_s28  ;;  %p343_p12 = scmp.lt.s32.totalorder %s337_s28, %s337_s28 }
  0x3a   :  { %234 = vmatpush3.bf16.msra.mxu0 %v233_v7  ;;  %v237_v13 = vpack.c.bf16 %v70_v10, %v69_v9  ;;  %v239_v14 = vpack.c.bf16 %v88_v12, %v87_v11  ;;  %v72_v16 = vld [vmem:[#allocation9 + $0x28] sm:$0xff]  ;;  %v89_v17 = vld [vmem:[#allocation9 + $0xb0] sm:$0xff]  ;;  %v90_v18 = vld [vmem:[#allocation9 + $0xb8] sm:$0xff] }
  0x3b   :  { %236 = vmatprep.subr.bf16.mxu0 %v235_v8  ;;  %v241_v19 = vpack.c.bf16 %v72_v16, %v71_v15  ;;  %v243_v20 = vpack.c.bf16 %v90_v18, %v89_v17  ;;  %v73_v21 = vld [vmem:[#allocation9 + $0x30] sm:$0xff]  ;;  %v74_v22 = vld [vmem:[#allocation9 + $0x38] sm:$0xff]  ;;  %v91_v23 = vld [vmem:[#allocation9 + $0xc0] sm:$0xff]  ;;  %p344_p13 = por %p343_p12, %p342_p11 }
  0x3c   :  { %v92_v24 = vld [vmem:[#allocation9 + $0xc8] sm:$0xff]  ;;  %v59_v25 = vld [vmem:[#allocation7] sm:$0xff]  ;;  %v245_v26 = vpack.c.bf16 %v74_v22, %v73_v21  ;;  %v75_v28 = vld [vmem:[#allocation9 + $0x40] sm:$0xff] }
  0x3d   :  { %170 = vmatprep.mubr.f32.mxu0 %v59_v25  ;;  %v247_v27 = vpack.c.bf16 %v92_v24, %v91_v23  ;;  %v76_v29 = vld [vmem:[#allocation9 + $0x48] sm:$0xff]  ;;  %v93_v30 = vld [vmem:[#allocation9 + $0xd0] sm:$0xff]  ;;  %v94_v31 = vld [vmem:[#allocation9 + $0xd8] sm:$0xff]  ;;  %p345_p0 = pnand %p344_p13, %p338_p10 }
  0x3e   :  { %238 = vmatpush3.bf16.msra.mxu0 %v237_v13  ;;  %v249_v32 = vpack.c.bf16 %v76_v29, %v75_v28  ;;  %v251_v33 = vpack.c.bf16 %v94_v31, %v93_v30  ;;  %v77_v34 = vld [vmem:[#allocation9 + $0x50] sm:$0xff]  ;;  %v78_v35 = vld [vmem:[#allocation9 + $0x58] sm:$0xff]  ;;  %v95_v36 = vld [vmem:[#allocation9 + $0xe0] sm:$0xff] }
  0x3f   :  { %240 = vmatprep.subr.bf16.mxu0 %v239_v14  ;;  %v96_v37 = vld [vmem:[#allocation9 + $0xe8] sm:$0xff]  ;;  %v253_v38 = vpack.c.bf16 %v78_v35, %v77_v34  ;;  %v79_v40 = vld [vmem:[#allocation9 + $0x60] sm:$0xff]  ;;  %v97_v42 = vld [vmem:[#allocation9 + $0xf0] sm:$0xff] }
  0x40   :  { %v255_v39 = vpack.c.bf16 %v96_v37, %v95_v36  ;;  %v80_v41 = vld [vmem:[#allocation9 + $0x68] sm:$0xff]  ;;  %v98_v43 = vld [vmem:[#allocation9 + $0xf8] sm:$0xff]  ;;  %v81_v46 = vld [vmem:[#allocation9 + $0x70] sm:$0xff] }
  0x41   :  { %v257_v44 = vpack.c.bf16 %v80_v41, %v79_v40  ;;  %v259_v45 = vpack.c.bf16 %v98_v43, %v97_v42  ;;  %v82_v47 = vld [vmem:[#allocation9 + $0x78] sm:$0xff]  ;;  %v61_v49 = vld [vmem:[#allocation4] sm:$0xff] }
  0x42   :  { %242 = vmatpush3.bf16.msra.mxu0 %v241_v19  ;;  %v261_v48 = vpack.c.bf16 %v82_v47, %v81_v46  ;;  %v195_v51 = vld [vmem:[%s450_s3] ss:$0 sm:$0xff] }
  0x43   :  { %244 = vmatprep.subr.bf16.mxu0 %v243_v20 }
  0x46   :  { %246 = vmatpush3.bf16.msra.mxu0 %v245_v26 }
  0x47   :  { %248 = vmatprep.subr.bf16.mxu0 %v247_v27 }
  0x4a   :  { %250 = vmatpush3.bf16.msra.mxu0 %v249_v32 }
  0x4b   :  { %252 = vmatprep.subr.bf16.mxu0 %v251_v33 }
  0x4e   :  { %254 = vmatpush3.bf16.msra.mxu0 %v253_v38 }
  0x4f   :  { %256 = vmatprep.subr.bf16.mxu0 %v255_v39 }
  0x52   :  { %258 = vmatpush3.bf16.msra.mxu0 %v257_v44 }
  0x53   :  { %260 = vmatprep.subr.bf16.mxu0 %v259_v45 }
  0x56   :  { %262 = vmatpush3.bf16.msra.mxu0 %v261_v48 }
  0x59   :  { %171 = vmatmul.mubr.f32.vlgmr.msra.gmra.mrb[0].mxu0 %v61_v49 }
 0x12c   :  { %v228_v50 = vpop.f32.mrb[0].mxu0 }
 0x12d   :  { %v229_v52 = vpop.f32.mrb[1].mxu0 }
 0x12e   :  { %v230_v53 = vadd.f32 %v229_v52, %v228_v50 }
 0x130   :  { %v173_v54 = vadd.f32 %v230_v53, %v195_v51 }
 0x132   :  { %269 = vtanh.f32 %v173_v54 }
 0x13c   :  { %v270_v55 = vpop.eup %269 }
 0x13d   :  { %178 = vst [vmem:[#allocation10] sm:$0xff] %v270_v55 }
 0x13e   :  { %348 = shalt.err (!%p345_p0)
}
 0x13f   :  { %s349_s3 = scalar_lea.hbm %s451_s4, 128 }
 0x140   :  { %p350_p1 = scmp.ne.s32.totalorder %s451_s4, %s349_s3  ;;  %p353_p2 = scmp.lt.u32.totalorder %s349_s3, %s451_s4 }
 0x142   :  { %p355_p3 = pnand %p353_p2, %p350_p1 }
 0x144   :  { %358 = shalt.err (!%p355_p3)
}
 0x145   :  { %188 = dma.vmem_to_hbm [thread:$0]  %s186_s27, 128, %s451_s4, [#allocation6]  }
 0x146   :  { %363 = dma.done.wait [#allocation6], 128  }
 0x147   :  { %364 = vsyncadd [#allocation6], 4294967168 }
 0x148   :  { %192 = vsyncpa [#allocation5], 1 }
 0x149   :  { %193 = vsyncpa [#allocation8], 1 }
 0x14a   :  { %194 = vsyncpa [#allocation6], 1 }

</bundles_post_ra>
